<compile_context>
chip_gen: v6e
topology: v6e:2x2x1
jax: 0.10.0
libtpu: 0.0.40
codegen_flags: <defaults>
</compile_context>

<pallas_src>
import jax
import jax.numpy as jnp
from jax.experimental import pallas as pl
from jax.experimental.pallas import tpu as pltpu

COMM_DIM = 10


def _silu(x):
    # x * sigmoid(x); sigmoid via tanh identity -> EUP transcendental path,
    # no transient inf from exp(-x) overflow.  Computed in f32.
    return x * (0.5 * (jnp.tanh(0.5 * x) + 1.0))


def critic_kernel(x_ref, w1_ref, b1_ref, w2_ref, b2_ref, w3_ref, b3_ref,
                  w4_ref, b4_ref, o_ref):
    # Layer 1: single (tb, in_dim) @ (in_dim, hid) bf16 matmul, f32 accumulate.
    h = jnp.dot(x_ref[...], w1_ref[...], preferred_element_type=jnp.float32)
    h = _silu(h + b1_ref[...])
    # Hidden layers 2/3: cast the f32 activations back to bf16 for the MXU.
    h = _silu(jnp.dot(h.astype(w2_ref.dtype), w2_ref[...],
                      preferred_element_type=jnp.float32) + b2_ref[...])
    h = _silu(jnp.dot(h.astype(w3_ref.dtype), w3_ref[...],
                      preferred_element_type=jnp.float32) + b3_ref[...])
    # Final (hid -> 1): VPU multiply + lane reduction; scalar bias from SMEM.
    out = jnp.sum(h * w4_ref[...], axis=-1, keepdims=True) + b4_ref[0]
    o_ref[...] = out.astype(o_ref.dtype)


def critic_forward(s, a, idx, params, obs_dim, act_dim, tile_b=2048):
    """Reproduces Critic.forward(s, a, idx).

    s: (N, B, obs_full), a: (N, B, act_full); idx MUST be a static Python int
    (same contract as the PyTorch `if idx != 0:` branch).  Returns (B, 1) f32.
    """
    idx = int(idx)  # must be static (mirrors the Python-level `if idx != 0`)
    n_agents, B, obs_full = s.shape
    act_full = a.shape[2]
    obs_per = obs_full - COMM_DIM
    act_per = act_full - COMM_DIM
    hid = params["w1"].shape[1]
    in_dim = obs_dim + act_dim
    assert obs_dim == n_agents * obs_per and act_dim == n_agents * act_per

    # ---- trace-time input prep: strip / swap / transpose / concat ----------
    # Done at the XLA level so the kernel streams ONE lane-dense (B, in_dim)
    # bf16 activation (no per-agent zero-padded tiles, no extra f32 HBM pass).
    ss = s[:, :, :obs_per]
    aa = a[:, :, :act_per]
    if idx != 0:
        perm = list(range(n_agents))
        perm[0], perm[idx] = perm[idx], perm[0]
        perm = jnp.asarray(perm)
        ss = ss[perm]
        aa = aa[perm]
    x = jnp.concatenate(
        [jnp.transpose(ss, (1, 0, 2)).reshape(B, obs_dim),
         jnp.transpose(aa, (1, 0, 2)).reshape(B, act_dim)],
        axis=-1).astype(jnp.bfloat16)                      # bf16 into the MXU

    # ---- weights: bf16 for the MXU, f32 biases / final row -----------------
    w1 = params["w1"].astype(jnp.bfloat16)                  # (in_dim, hid)
    w2 = params["w2"].astype(jnp.bfloat16)                  # (hid, hid)
    w3 = params["w3"].astype(jnp.bfloat16)                  # (hid, hid)
    b1 = params["b1"].astype(jnp.float32).reshape(1, hid)
    b2 = params["b2"].astype(jnp.float32).reshape(1, hid)
    b3 = params["b3"].astype(jnp.float32).reshape(1, hid)
    w4 = params["w4"].astype(jnp.float32).reshape(1, hid)   # row vector
    b4 = params["b4"].astype(jnp.float32).reshape(1)        # SMEM scalar

    # ---- batch tiling -------------------------------------------------------
    if B <= tile_b:
        tb = B
        # Keep >=2 grid steps for large batches so the "parallel" axis can be
        # split across v7x's two TensorCores.
        if B >= 1024 and (B // 2) % 8 == 0:
            tb = B // 2
    else:
        tb = max(8, (tile_b // 8) * 8)                       # multiple of 8
    grid = (pl.cdiv(B, tb),)

    # ---- VMEM budget (stay well under v7x's 64 MiB / TC) -------------------
    weight_bytes = 2 * (in_dim * hid + 2 * hid * hid) + 4 * (4 * hid + 1)
    act_bytes = 2 * (tb * in_dim * 2) + 2 * (tb * 4)          # dbl-buffered x + out
    scratch_bytes = 4 * tb * hid * 4                          # f32 hidden-tile headroom
    vmem_limit = int(min(56 << 20,
                         max(16 << 20,
                             2 * (weight_bytes + act_bytes + scratch_bytes))))

    flops = 2 * B * (in_dim * hid + 2 * hid * hid + hid)
    transcendentals = 3 * B * hid
    bytes_accessed = 2 * B * in_dim + weight_bytes + 4 * B

    def make_call(single_buffer_weights):
        def wspec(shape):
            kwargs = {}
            if single_buffer_weights:
                # Constant-index weights: one resident copy, no double buffer.
                kwargs["pipeline_mode"] = pl.Buffered(1)
            return pl.BlockSpec(shape, lambda i: (0,) * len(shape), **kwargs)

        in_specs = [
            pl.BlockSpec((tb, in_dim), lambda i: (i, 0)),      # x (batch-tiled)
            wspec((in_dim, hid)),                              # w1
            wspec((1, hid)),                                   # b1
            wspec((hid, hid)),                                 # w2
            wspec((1, hid)),                                   # b2
            wspec((hid, hid)),                                 # w3
            wspec((1, hid)),                                   # b3
            wspec((1, hid)),                                   # w4 (row)
            pl.BlockSpec(memory_space=pltpu.MemorySpace.SMEM), # b4 (scalar)
        ]
        return pl.pallas_call(
            critic_kernel,
            out_shape=jax.ShapeDtypeStruct((B, 1), jnp.float32),
            grid=grid,
            in_specs=in_specs,
            # TODO(synk): output stays (tb, 1) column blocks; a lane-dense
            # (1, tb) store would need a transposed tail layer for a micro win.
            out_specs=pl.BlockSpec((tb, 1), lambda i: (i, 0)),
            compiler_params=pltpu.CompilerParams(
                dimension_semantics=("parallel",),             # megacore split
                vmem_limit_bytes=vmem_limit,
            ),
            cost_estimate=pl.CostEstimate(
                flops=flops,
                transcendentals=transcendentals,
                bytes_accessed=bytes_accessed,
            ),
        )

    args = (x, w1, b1, w2, b2, w3, b3, w4, b4)
    try:
        return make_call(True)(*args)
    except Exception:
        # Older jax without pipeline_mode / Buffered(1): fall back to default
        # (double-buffered) weight blocks — semantics are identical.
        return make_call(False)(*args)


def init_params(key, in_dim, hid_dim):
    ks = jax.random.split(key, 8)

    def lin(kw, kb, fan_in, fan_out):
        bound = 1.0 / jnp.sqrt(fan_in)
        w = jax.random.uniform(kw, (fan_in, fan_out), jnp.float32, -bound, bound)
        b = jax.random.uniform(kb, (1, fan_out), jnp.float32, -bound, bound)
        return w, b

    w1, b1 = lin(ks[0], ks[1], in_dim, hid_dim)
    w2, b2 = lin(ks[2], ks[3], hid_dim, hid_dim)
    w3, b3 = lin(ks[4], ks[5], hid_dim, hid_dim)
    w4, b4 = lin(ks[6], ks[7], hid_dim, 1)
    return {"w1": w1, "b1": b1, "w2": w2, "b2": b2,
            "w3": w3, "b3": b3, "w4": w4, "b4": b4}


if __name__ == "__main__":
    key = jax.random.PRNGKey(0)
    k_s, k_a, k_p = jax.random.split(key, 3)

    # Small synthetic shapes:
    N_AGENTS = 3
    B = 16
    OBS_PER_FULL = 24     # per-agent obs incl. COMM_DIM
    ACT_PER_FULL = 16     # per-agent act incl. COMM_DIM
    HID_DIM = 32
    IDX = 1

    obs_per = OBS_PER_FULL - COMM_DIM           # 14
    act_per = ACT_PER_FULL - COMM_DIM           # 6
    obs_dim = N_AGENTS * obs_per                # 42
    act_dim = N_AGENTS * act_per                # 18
    in_dim = obs_dim + act_dim                  # 60

    s = jax.random.normal(k_s, (N_AGENTS, B, OBS_PER_FULL), jnp.float32)
    a = jax.random.normal(k_a, (N_AGENTS, B, ACT_PER_FULL), jnp.float32)
    params = init_params(k_p, in_dim, HID_DIM)

    # Small batch tile so the example actually exercises a 2-step grid.
    out = critic_forward(s, a, IDX, params, obs_dim, act_dim, tile_b=8)
    out = jax.block_until_ready(out)

    # Pure-JAX reference (mirrors the PyTorch module exactly, in f32).
    def ref(s, a, idx):
        ss = s[:, :, :-COMM_DIM]
        aa = a[:, :, :-COMM_DIM]
        if idx != 0:
            ss = ss.at[0].set(s[idx, :, :-COMM_DIM]).at[idx].set(s[0, :, :-COMM_DIM])
            aa = aa.at[0].set(a[idx, :, :-COMM_DIM]).at[idx].set(a[0, :, :-COMM_DIM])
        x = jnp.concatenate(
            [jnp.transpose(ss, (1, 0, 2)).reshape(B, obs_dim),
             jnp.transpose(aa, (1, 0, 2)).reshape(B, act_dim)], -1)
        h = jax.nn.silu(x @ params["w1"] + params["b1"])
        h = jax.nn.silu(h @ params["w2"] + params["b2"])
        h = jax.nn.silu(h @ params["w3"] + params["b3"])
        return h @ params["w4"] + params["b4"]

    expected = ref(s, a, IDX)
    assert out.shape == (B, 1)
    err = float(jnp.max(jnp.abs(out - expected)))
    # Tolerance loosened vs the f32 reference because the kernel feeds the MXU
    # bf16 inputs (with f32 accumulation), per the performance review.
    assert err < 2e-2, f"mismatch vs reference: max abs err = {err}"
    print("KERNEL_OK")
</pallas_src>

<mosaic_0001>
module attributes {stable_mosaic.version = 11 : i64} {
  func.func @critic_kernel(%arg0: i32, %arg1: memref<8x60xbf16, #tpu.memory_space<vmem>>, %arg2: memref<60x32xbf16, #tpu.memory_space<vmem>>, %arg3: memref<1x32xf32, #tpu.memory_space<vmem>>, %arg4: memref<32x32xbf16, #tpu.memory_space<vmem>>, %arg5: memref<1x32xf32, #tpu.memory_space<vmem>>, %arg6: memref<32x32xbf16, #tpu.memory_space<vmem>>, %arg7: memref<1x32xf32, #tpu.memory_space<vmem>>, %arg8: memref<1x32xf32, #tpu.memory_space<vmem>>, %arg9: memref<1xf32, #tpu.memory_space<smem>>, %arg10: memref<8x1xf32, #tpu.memory_space<vmem>>) attributes {dimension_semantics = [#tpu.dimension_semantics<parallel>], iteration_bounds = array<i64: 2>, scalar_prefetch = 0 : i64, scratch_operands = 0 : i64, tpu.core_type = #tpu.core_type<tc>, window_params = [{transform_indices = @transform_0, window_bounds = array<i64: 8, 60>}, {pipeline_mode = #tpu.pipeline_mode<synchronous>, transform_indices = @transform_1, window_bounds = array<i64: 60, 32>}, {pipeline_mode = #tpu.pipeline_mode<synchronous>, transform_indices = @transform_2, window_bounds = array<i64: 1, 32>}, {pipeline_mode = #tpu.pipeline_mode<synchronous>, transform_indices = @transform_3, window_bounds = array<i64: 32, 32>}, {pipeline_mode = #tpu.pipeline_mode<synchronous>, transform_indices = @transform_4, window_bounds = array<i64: 1, 32>}, {pipeline_mode = #tpu.pipeline_mode<synchronous>, transform_indices = @transform_5, window_bounds = array<i64: 32, 32>}, {pipeline_mode = #tpu.pipeline_mode<synchronous>, transform_indices = @transform_6, window_bounds = array<i64: 1, 32>}, {pipeline_mode = #tpu.pipeline_mode<synchronous>, transform_indices = @transform_7, window_bounds = array<i64: 1, 32>}, {transform_indices = @transform_8, window_bounds = array<i64: 1>}, {transform_indices = @transform_9, window_bounds = array<i64: 8, 1>}]} {
    %c0 = arith.constant 0 : index
    %c0_0 = arith.constant 0 : index
    %0 = vector.load %arg1[%c0, %c0_0] : memref<8x60xbf16, #tpu.memory_space<vmem>>, vector<8x60xbf16>
    %c0_1 = arith.constant 0 : index
    %c0_2 = arith.constant 0 : index
    %1 = vector.load %arg2[%c0_1, %c0_2] : memref<60x32xbf16, #tpu.memory_space<vmem>>, vector<60x32xbf16>
    %cst = arith.constant dense<0.000000e+00> : vector<8x32xf32>
    %2 = tpu.matmul %0, %1, %cst {dimension_numbers = #tpu.dot_dimension_numbers<[1], [0], [0], [1], [0, 0, 1, 1], [], []>} : vector<8x60xbf16>, vector<60x32xbf16>, vector<8x32xf32> -> vector<8x32xf32>
    %c0_3 = arith.constant 0 : index
    %c0_4 = arith.constant 0 : index
    %3 = vector.load %arg3[%c0_3, %c0_4] : memref<1x32xf32, #tpu.memory_space<vmem>>, vector<1x32xf32>
    %4 = vector.broadcast %3 : vector<1x32xf32> to vector<8x32xf32>
    %5 = arith.addf %2, %4 : vector<8x32xf32>
    %cst_5 = arith.constant 5.000000e-01 : f32
    %6 = vector.broadcast %cst_5 : f32 to vector<8x32xf32>
    %7 = arith.mulf %6, %5 : vector<8x32xf32>
    %8 = math.tanh %7 : vector<8x32xf32>
    %cst_6 = arith.constant 1.000000e+00 : f32
    %9 = vector.broadcast %cst_6 : f32 to vector<8x32xf32>
    %10 = arith.addf %8, %9 : vector<8x32xf32>
    %cst_7 = arith.constant 5.000000e-01 : f32
    %11 = vector.broadcast %cst_7 : f32 to vector<8x32xf32>
    %12 = arith.mulf %11, %10 : vector<8x32xf32>
    %13 = arith.mulf %5, %12 : vector<8x32xf32>
    %14 = arith.truncf %13 : vector<8x32xf32> to vector<8x32xbf16>
    %c0_8 = arith.constant 0 : index
    %c0_9 = arith.constant 0 : index
    %15 = vector.load %arg4[%c0_8, %c0_9] : memref<32x32xbf16, #tpu.memory_space<vmem>>, vector<32x32xbf16>
    %cst_10 = arith.constant dense<0.000000e+00> : vector<8x32xf32>
    %16 = tpu.matmul %14, %15, %cst_10 {dimension_numbers = #tpu.dot_dimension_numbers<[1], [0], [0], [1], [0, 0, 1, 1], [], []>} : vector<8x32xbf16>, vector<32x32xbf16>, vector<8x32xf32> -> vector<8x32xf32>
    %c0_11 = arith.constant 0 : index
    %c0_12 = arith.constant 0 : index
    %17 = vector.load %arg5[%c0_11, %c0_12] : memref<1x32xf32, #tpu.memory_space<vmem>>, vector<1x32xf32>
    %18 = vector.broadcast %17 : vector<1x32xf32> to vector<8x32xf32>
    %19 = arith.addf %16, %18 : vector<8x32xf32>
    %cst_13 = arith.constant 5.000000e-01 : f32
    %20 = vector.broadcast %cst_13 : f32 to vector<8x32xf32>
    %21 = arith.mulf %20, %19 : vector<8x32xf32>
    %22 = math.tanh %21 : vector<8x32xf32>
    %cst_14 = arith.constant 1.000000e+00 : f32
    %23 = vector.broadcast %cst_14 : f32 to vector<8x32xf32>
    %24 = arith.addf %22, %23 : vector<8x32xf32>
    %cst_15 = arith.constant 5.000000e-01 : f32
    %25 = vector.broadcast %cst_15 : f32 to vector<8x32xf32>
    %26 = arith.mulf %25, %24 : vector<8x32xf32>
    %27 = arith.mulf %19, %26 : vector<8x32xf32>
    %28 = arith.truncf %27 : vector<8x32xf32> to vector<8x32xbf16>
    %c0_16 = arith.constant 0 : index
    %c0_17 = arith.constant 0 : index
    %29 = vector.load %arg6[%c0_16, %c0_17] : memref<32x32xbf16, #tpu.memory_space<vmem>>, vector<32x32xbf16>
    %cst_18 = arith.constant dense<0.000000e+00> : vector<8x32xf32>
    %30 = tpu.matmul %28, %29, %cst_18 {dimension_numbers = #tpu.dot_dimension_numbers<[1], [0], [0], [1], [0, 0, 1, 1], [], []>} : vector<8x32xbf16>, vector<32x32xbf16>, vector<8x32xf32> -> vector<8x32xf32>
    %c0_19 = arith.constant 0 : index
    %c0_20 = arith.constant 0 : index
    %31 = vector.load %arg7[%c0_19, %c0_20] : memref<1x32xf32, #tpu.memory_space<vmem>>, vector<1x32xf32>
    %32 = vector.broadcast %31 : vector<1x32xf32> to vector<8x32xf32>
    %33 = arith.addf %30, %32 : vector<8x32xf32>
    %cst_21 = arith.constant 5.000000e-01 : f32
    %34 = vector.broadcast %cst_21 : f32 to vector<8x32xf32>
    %35 = arith.mulf %34, %33 : vector<8x32xf32>
    %36 = math.tanh %35 : vector<8x32xf32>
    %cst_22 = arith.constant 1.000000e+00 : f32
    %37 = vector.broadcast %cst_22 : f32 to vector<8x32xf32>
    %38 = arith.addf %36, %37 : vector<8x32xf32>
    %cst_23 = arith.constant 5.000000e-01 : f32
    %39 = vector.broadcast %cst_23 : f32 to vector<8x32xf32>
    %40 = arith.mulf %39, %38 : vector<8x32xf32>
    %41 = arith.mulf %33, %40 : vector<8x32xf32>
    %c0_24 = arith.constant 0 : index
    %c0_25 = arith.constant 0 : index
    %42 = vector.load %arg8[%c0_24, %c0_25] : memref<1x32xf32, #tpu.memory_space<vmem>>, vector<1x32xf32>
    %43 = vector.broadcast %42 : vector<1x32xf32> to vector<8x32xf32>
    %44 = arith.mulf %41, %43 : vector<8x32xf32>
    %cst_26 = arith.constant dense<0.000000e+00> : vector<8xf32>
    %45 = vector.multi_reduction <add>, %44, %cst_26 [1] : vector<8x32xf32> to vector<8xf32>
    %46 = vector.shape_cast %45 : vector<8xf32> to vector<8x1xf32>
    %c0_27 = arith.constant 0 : index
    %47 = memref.load %arg9[%c0_27] : memref<1xf32, #tpu.memory_space<smem>>
    %48 = vector.broadcast %47 : f32 to vector<8x1xf32>
    %49 = arith.addf %46, %48 : vector<8x1xf32>
    %c0_28 = arith.constant 0 : index
    %c0_29 = arith.constant 0 : index
    %50 = vector.load %arg10[%c0_28, %c0_29] : memref<8x1xf32, #tpu.memory_space<vmem>>, vector<8x1xf32>
    tpu.vector_store %arg10[%c0_28, %c0_29], %49 {strides = array<i32>} : memref<8x1xf32, #tpu.memory_space<vmem>>, vector<8x1xf32>,
    return
  }
  func.func @transform_0(%arg0: i32) -> (i32, i32) {
    %c0_i32 = arith.constant 0 : i32
    %c0_i32_0 = arith.constant 0 : i32
    return %arg0, %c0_i32 : i32, i32
  }
  func.func @transform_1(%arg0: i32) -> (i32, i32) {
    %c0_i32 = arith.constant 0 : i32
    %c0_i32_0 = arith.constant 0 : i32
    %c0_i32_1 = arith.constant 0 : i32
    return %c0_i32, %c0_i32_0 : i32, i32
  }
  func.func @transform_2(%arg0: i32) -> (i32, i32) {
    %c0_i32 = arith.constant 0 : i32
    %c0_i32_0 = arith.constant 0 : i32
    %c0_i32_1 = arith.constant 0 : i32
    return %c0_i32, %c0_i32_0 : i32, i32
  }
  func.func @transform_3(%arg0: i32) -> (i32, i32) {
    %c0_i32 = arith.constant 0 : i32
    %c0_i32_0 = arith.constant 0 : i32
    %c0_i32_1 = arith.constant 0 : i32
    return %c0_i32, %c0_i32_0 : i32, i32
  }
  func.func @transform_4(%arg0: i32) -> (i32, i32) {
    %c0_i32 = arith.constant 0 : i32
    %c0_i32_0 = arith.constant 0 : i32
    %c0_i32_1 = arith.constant 0 : i32
    return %c0_i32, %c0_i32_0 : i32, i32
  }
  func.func @transform_5(%arg0: i32) -> (i32, i32) {
    %c0_i32 = arith.constant 0 : i32
    %c0_i32_0 = arith.constant 0 : i32
    %c0_i32_1 = arith.constant 0 : i32
    return %c0_i32, %c0_i32_0 : i32, i32
  }
  func.func @transform_6(%arg0: i32) -> (i32, i32) {
    %c0_i32 = arith.constant 0 : i32
    %c0_i32_0 = arith.constant 0 : i32
    %c0_i32_1 = arith.constant 0 : i32
    return %c0_i32, %c0_i32_0 : i32, i32
  }
  func.func @transform_7(%arg0: i32) -> (i32, i32) {
    %c0_i32 = arith.constant 0 : i32
    %c0_i32_0 = arith.constant 0 : i32
    %c0_i32_1 = arith.constant 0 : i32
    return %c0_i32, %c0_i32_0 : i32, i32
  }
  func.func @transform_8(%arg0: i32) -> i32 {
    %c0_i32 = arith.constant 0 : i32
    %c0_i32_0 = arith.constant 0 : i32
    return %c0_i32 : i32
  }
  func.func @transform_9(%arg0: i32) -> (i32, i32) {
    %c0_i32 = arith.constant 0 : i32
    %c0_i32_0 = arith.constant 0 : i32
    return %arg0, %c0_i32 : i32, i32
  }
}

module attributes {stable_mosaic.version = 11 : i64} {
  func.func @critic_kernel(%arg0: i32, %arg1: memref<8x60xbf16, #tpu.memory_space<vmem>>, %arg2: memref<60x32xbf16, #tpu.memory_space<vmem>>, %arg3: memref<1x32xf32, #tpu.memory_space<vmem>>, %arg4: memref<32x32xbf16, #tpu.memory_space<vmem>>, %arg5: memref<1x32xf32, #tpu.memory_space<vmem>>, %arg6: memref<32x32xbf16, #tpu.memory_space<vmem>>, %arg7: memref<1x32xf32, #tpu.memory_space<vmem>>, %arg8: memref<1x32xf32, #tpu.memory_space<vmem>>, %arg9: memref<1xf32, #tpu.memory_space<smem>>, %arg10: memref<8x1xf32, #tpu.memory_space<vmem>>) attributes {dimension_semantics = [#tpu.dimension_semantics<parallel>], iteration_bounds = array<i64: 2>, scalar_prefetch = 0 : i64, scratch_operands = 0 : i64, tpu.core_type = #tpu.core_type<tc>, window_params = [{transform_indices = @transform_0, window_bounds = array<i64: 8, 60>}, {pipeline_mode = #tpu.pipeline_mode<synchronous>, transform_indices = @transform_1, window_bounds = array<i64: 60, 32>}, {pipeline_mode = #tpu.pipeline_mode<synchronous>, transform_indices = @transform_2, window_bounds = array<i64: 1, 32>}, {pipeline_mode = #tpu.pipeline_mode<synchronous>, transform_indices = @transform_3, window_bounds = array<i64: 32, 32>}, {pipeline_mode = #tpu.pipeline_mode<synchronous>, transform_indices = @transform_4, window_bounds = array<i64: 1, 32>}, {pipeline_mode = #tpu.pipeline_mode<synchronous>, transform_indices = @transform_5, window_bounds = array<i64: 32, 32>}, {pipeline_mode = #tpu.pipeline_mode<synchronous>, transform_indices = @transform_6, window_bounds = array<i64: 1, 32>}, {pipeline_mode = #tpu.pipeline_mode<synchronous>, transform_indices = @transform_7, window_bounds = array<i64: 1, 32>}, {transform_indices = @transform_8, window_bounds = array<i64: 1>}, {transform_indices = @transform_9, window_bounds = array<i64: 8, 1>}]} {
    %c0 = arith.constant 0 : index
    %c0_0 = arith.constant 0 : index
    %0 = vector.load %arg1[%c0, %c0_0] : memref<8x60xbf16, #tpu.memory_space<vmem>>, vector<8x60xbf16>
    %c0_1 = arith.constant 0 : index
    %c0_2 = arith.constant 0 : index
    %1 = vector.load %arg2[%c0_1, %c0_2] : memref<60x32xbf16, #tpu.memory_space<vmem>>, vector<60x32xbf16>
    %cst = arith.constant dense<0.000000e+00> : vector<8x32xf32>
    %2 = tpu.matmul %0, %1, %cst {dimension_numbers = #tpu.dot_dimension_numbers<[1], [0], [0], [1], [0, 0, 1, 1], [], []>} : vector<8x60xbf16>, vector<60x32xbf16>, vector<8x32xf32> -> vector<8x32xf32>
    %c0_3 = arith.constant 0 : index
    %c0_4 = arith.constant 0 : index
    %3 = vector.load %arg3[%c0_3, %c0_4] : memref<1x32xf32, #tpu.memory_space<vmem>>, vector<1x32xf32>
    %4 = vector.broadcast %3 : vector<1x32xf32> to vector<8x32xf32>
    %5 = arith.addf %2, %4 : vector<8x32xf32>
    %cst_5 = arith.constant 5.000000e-01 : f32
    %6 = vector.broadcast %cst_5 : f32 to vector<8x32xf32>
    %7 = arith.mulf %6, %5 : vector<8x32xf32>
    %8 = math.tanh %7 : vector<8x32xf32>
    %cst_6 = arith.constant 1.000000e+00 : f32
    %9 = vector.broadcast %cst_6 : f32 to vector<8x32xf32>
    %10 = arith.addf %8, %9 : vector<8x32xf32>
    %cst_7 = arith.constant 5.000000e-01 : f32
    %11 = vector.broadcast %cst_7 : f32 to vector<8x32xf32>
    %12 = arith.mulf %11, %10 : vector<8x32xf32>
    %13 = arith.mulf %5, %12 : vector<8x32xf32>
    %14 = arith.truncf %13 : vector<8x32xf32> to vector<8x32xbf16>
    %c0_8 = arith.constant 0 : index
    %c0_9 = arith.constant 0 : index
    %15 = vector.load %arg4[%c0_8, %c0_9] : memref<32x32xbf16, #tpu.memory_space<vmem>>, vector<32x32xbf16>
    %cst_10 = arith.constant dense<0.000000e+00> : vector<8x32xf32>
    %16 = tpu.matmul %14, %15, %cst_10 {dimension_numbers = #tpu.dot_dimension_numbers<[1], [0], [0], [1], [0, 0, 1, 1], [], []>} : vector<8x32xbf16>, vector<32x32xbf16>, vector<8x32xf32> -> vector<8x32xf32>
    %c0_11 = arith.constant 0 : index
    %c0_12 = arith.constant 0 : index
    %17 = vector.load %arg5[%c0_11, %c0_12] : memref<1x32xf32, #tpu.memory_space<vmem>>, vector<1x32xf32>
    %18 = vector.broadcast %17 : vector<1x32xf32> to vector<8x32xf32>
    %19 = arith.addf %16, %18 : vector<8x32xf32>
    %cst_13 = arith.constant 5.000000e-01 : f32
    %20 = vector.broadcast %cst_13 : f32 to vector<8x32xf32>
    %21 = arith.mulf %20, %19 : vector<8x32xf32>
    %22 = math.tanh %21 : vector<8x32xf32>
    %cst_14 = arith.constant 1.000000e+00 : f32
    %23 = vector.broadcast %cst_14 : f32 to vector<8x32xf32>
    %24 = arith.addf %22, %23 : vector<8x32xf32>
    %cst_15 = arith.constant 5.000000e-01 : f32
    %25 = vector.broadcast %cst_15 : f32 to vector<8x32xf32>
    %26 = arith.mulf %25, %24 : vector<8x32xf32>
    %27 = arith.mulf %19, %26 : vector<8x32xf32>
    %28 = arith.truncf %27 : vector<8x32xf32> to vector<8x32xbf16>
    %c0_16 = arith.constant 0 : index
    %c0_17 = arith.constant 0 : index
    %29 = vector.load %arg6[%c0_16, %c0_17] : memref<32x32xbf16, #tpu.memory_space<vmem>>, vector<32x32xbf16>
    %cst_18 = arith.constant dense<0.000000e+00> : vector<8x32xf32>
    %30 = tpu.matmul %28, %29, %cst_18 {dimension_numbers = #tpu.dot_dimension_numbers<[1], [0], [0], [1], [0, 0, 1, 1], [], []>} : vector<8x32xbf16>, vector<32x32xbf16>, vector<8x32xf32> -> vector<8x32xf32>
    %c0_19 = arith.constant 0 : index
    %c0_20 = arith.constant 0 : index
    %31 = vector.load %arg7[%c0_19, %c0_20] : memref<1x32xf32, #tpu.memory_space<vmem>>, vector<1x32xf32>
    %32 = vector.broadcast %31 : vector<1x32xf32> to vector<8x32xf32>
    %33 = arith.addf %30, %32 : vector<8x32xf32>
    %cst_21 = arith.constant 5.000000e-01 : f32
    %34 = vector.broadcast %cst_21 : f32 to vector<8x32xf32>
    %35 = arith.mulf %34, %33 : vector<8x32xf32>
    %36 = math.tanh %35 : vector<8x32xf32>
    %cst_22 = arith.constant 1.000000e+00 : f32
    %37 = vector.broadcast %cst_22 : f32 to vector<8x32xf32>
    %38 = arith.addf %36, %37 : vector<8x32xf32>
    %cst_23 = arith.constant 5.000000e-01 : f32
    %39 = vector.broadcast %cst_23 : f32 to vector<8x32xf32>
    %40 = arith.mulf %39, %38 : vector<8x32xf32>
    %41 = arith.mulf %33, %40 : vector<8x32xf32>
    %c0_24 = arith.constant 0 : index
    %c0_25 = arith.constant 0 : index
    %42 = vector.load %arg8[%c0_24, %c0_25] : memref<1x32xf32, #tpu.memory_space<vmem>>, vector<1x32xf32>
    %43 = vector.broadcast %42 : vector<1x32xf32> to vector<8x32xf32>
    %44 = arith.mulf %41, %43 : vector<8x32xf32>
    %cst_26 = arith.constant dense<0.000000e+00> : vector<8xf32>
    %45 = vector.multi_reduction <add>, %44, %cst_26 [1] : vector<8x32xf32> to vector<8xf32>
    %46 = vector.shape_cast %45 : vector<8xf32> to vector<8x1xf32>
    %c0_27 = arith.constant 0 : index
    %47 = memref.load %arg9[%c0_27] : memref<1xf32, #tpu.memory_space<smem>>
    %48 = vector.broadcast %47 : f32 to vector<8x1xf32>
    %49 = arith.addf %46, %48 : vector<8x1xf32>
    %c0_28 = arith.constant 0 : index
    %c0_29 = arith.constant 0 : index
    %50 = vector.load %arg10[%c0_28, %c0_29] : memref<8x1xf32, #tpu.memory_space<vmem>>, vector<8x1xf32>
    tpu.vector_store %arg10[%c0_28, %c0_29], %49 {strides = array<i32>} : memref<8x1xf32, #tpu.memory_space<vmem>>, vector<8x1xf32>,
    return
  }
  func.func @transform_0(%arg0: i32) -> (i32, i32) {
    %c0_i32 = arith.constant 0 : i32
    %c0_i32_0 = arith.constant 0 : i32
    return %arg0, %c0_i32 : i32, i32
  }
  func.func @transform_1(%arg0: i32) -> (i32, i32) {
    %c0_i32 = arith.constant 0 : i32
    %c0_i32_0 = arith.constant 0 : i32
    %c0_i32_1 = arith.constant 0 : i32
    return %c0_i32, %c0_i32_0 : i32, i32
  }
  func.func @transform_2(%arg0: i32) -> (i32, i32) {
    %c0_i32 = arith.constant 0 : i32
    %c0_i32_0 = arith.constant 0 : i32
    %c0_i32_1 = arith.constant 0 : i32
    return %c0_i32, %c0_i32_0 : i32, i32
  }
  func.func @transform_3(%arg0: i32) -> (i32, i32) {
    %c0_i32 = arith.constant 0 : i32
    %c0_i32_0 = arith.constant 0 : i32
    %c0_i32_1 = arith.constant 0 : i32
    return %c0_i32, %c0_i32_0 : i32, i32
  }
  func.func @transform_4(%arg0: i32) -> (i32, i32) {
    %c0_i32 = arith.constant 0 : i32
    %c0_i32_0 = arith.constant 0 : i32
    %c0_i32_1 = arith.constant 0 : i32
    return %c0_i32, %c0_i32_0 : i32, i32
  }
  func.func @transform_5(%arg0: i32) -> (i32, i32) {
    %c0_i32 = arith.constant 0 : i32
    %c0_i32_0 = arith.constant 0 : i32
    %c0_i32_1 = arith.constant 0 : i32
    return %c0_i32, %c0_i32_0 : i32, i32
  }
  func.func @transform_6(%arg0: i32) -> (i32, i32) {
    %c0_i32 = arith.constant 0 : i32
    %c0_i32_0 = arith.constant 0 : i32
    %c0_i32_1 = arith.constant 0 : i32
    return %c0_i32, %c0_i32_0 : i32, i32
  }
  func.func @transform_7(%arg0: i32) -> (i32, i32) {
    %c0_i32 = arith.constant 0 : i32
    %c0_i32_0 = arith.constant 0 : i32
    %c0_i32_1 = arith.constant 0 : i32
    return %c0_i32, %c0_i32_0 : i32, i32
  }
  func.func @transform_8(%arg0: i32) -> i32 {
    %c0_i32 = arith.constant 0 : i32
    %c0_i32_0 = arith.constant 0 : i32
    return %c0_i32 : i32
  }
  func.func @transform_9(%arg0: i32) -> (i32, i32) {
    %c0_i32 = arith.constant 0 : i32
    %c0_i32_0 = arith.constant 0 : i32
    return %arg0, %c0_i32 : i32, i32
  }
}

</mosaic_0001>

<bundles_post_ra>
// kernel: tpu_custom_call.1
= control target key start
LH: loop header
LB: loop body
LE: loop exit
PB: predicated region body
PF: predicated region fallthrough
CT: control target
= control target key end

     0   :  { %s786_s11 = smov 0   ;;  %s849_s0 = inlined_call_operand.vmem [shape: bf16[16,60], index: 0, kind: input, shape index: {}]   ;;  %s850_s1 = inlined_call_operand.vmem [shape: bf16[60,32], index: 1, kind: input, shape index: {}]   ;;  %s851_s2 = inlined_call_operand.vmem [shape: f32[1,32], index: 2, kind: input, shape index: {}]   ;;  %s852_s3 = inlined_call_operand.vmem [shape: bf16[32,32], index: 3, kind: input, shape index: {}]   ;;  %s853_s4 = inlined_call_operand.vmem [shape: f32[1,32], index: 4, kind: input, shape index: {}]   ;;  %s854_s5 = inlined_call_operand.vmem [shape: bf16[32,32], index: 5, kind: input, shape index: {}]   ;;  %s855_s6 = inlined_call_operand.vmem [shape: f32[1,32], index: 6, kind: input, shape index: {}]   ;;  %s856_s7 = inlined_call_operand.vmem [shape: f32[1,32], index: 7, kind: input, shape index: {}]   ;;  %s857_s8 = inlined_call_operand.<no memory space> [shape: f32[1], index: 8, kind: input, shape index: {}]   ;;  %s858_s9 = inlined_call_operand.vmem [shape: f32[16,1], index: 9, kind: output, shape index: {}]  }
   0x1   :  { %14 = sst [smem:[#allocation2]] %s857_s8 }
   0x2 LB: > { %s636_s12 = sadd.s32 4294967295, %s729_s11   ;;  %p640_p0 = scmp.ge.s32.totalorder %s729_s11, 1  ;;  %s729_s11 = sphi %s786_s11, %s20_s11  }
   0x3   : > { %p287_p1 = scmp.lt.s32.totalorder %s729_s11, 3 }
   0x5   : > { %p288_p2 = pnand %p640_p0, %p287_p1 }
   0x6   : > { %p321_p3 = scmp.lt.s32.totalorder (!%p288_p2), %s636_s12, 1  ;;  %s578_s20 = sld [smem:[#allocation2]] (!%p288_p2) }
   0x7   : > { %291 = sbr.rel (%p288_p2) target bundleno = 829 (0x33d), region = 56 }
   0xc   : > { %vm373_vm0 = vcmask 1045504   ;;  %v731_v0 = vmov 0.0   ;;  %v709_v1 = vld [vmem:[%s850_s1 + $0x18] sm:$0x3f]   ;;  %vm732_vm1 = vmmov 0   ;;  %v710_v3 = vld [vmem:[%s850_s1 + $0x10] sm:$0xff]   ;;  %v579_v49 = vstv %s578_s20 }
   0xd   : > { %671 = vmatprep.subr.bf16.mxu0 %v731_v0  ;;  %683 = vmatprep.subr.bf16.mxu1 %v731_v0  ;;  %v375_v2 = vsel %vm373_vm0, %v709_v1, 0  ;;  %s860_s12 = smov (!%p321_p3, %s636_s12), 1  ;;  %v711_v4 = vld [vmem:[%s850_s1 + $0x8] sm:$0xff]   ;;  %v712_v5 = vld [vmem:[%s850_s1] sm:$0xff]   ;;  %vm369_vm2 = vcmask 490496   ;;  %vm446_vm3 = vcmask 261120  }
   0xe   : > { %679 = vmatprep.mubr.msk.bf16.mxu0 %vm732_vm1, %v731_v0  ;;  %687 = vmatprep.mubr.msk.bf16.mxu1 %vm732_vm1, %v731_v0  ;;  %s641_s18 = sshll.u32 %s860_s12, 2  ;;  %v713_v7 = vld [vmem:[%s852_s3 + $0x8] sm:$0xff]   ;;  %v714_v8 = vld [vmem:[%s852_s3] sm:$0xff]   ;;  %s642_s21 = sshll.u32 %s860_s12, 3  ;;  %vm581_vm4 = vcmask 7168  }
   0xf   : > { %672 = vmatpush3.bf16.msra.mxu0 %v375_v2  ;;  %s324_s23 = scalar_lea.vmem %s849_s0, %s641_s18  ;;  %684 = vmatpush3.bf16.msra.mxu1 %v713_v7  ;;  %v643_v9 = vld [vmem:[%s851_s2] ss:$0 sm:$0xff]  ;;  %v715_v21 = vld [vmem:[%s854_s5 + $0x8] sm:$0xff]   ;;  %s328_s24 = scalar_lea.vmem %s858_s9, %s642_s21 }
  0x10   : > { %673 = vmatprep.subr.bf16.mxu0 %v731_v0  ;;  %v330_v6 = vld [vmem:[%s324_s23] sm:$0xf]  ;;  %685 = vmatprep.subr.bf16.mxu1 %v731_v0 }
  0x11   : > { %v716_v22 = vld [vmem:[%s854_s5] sm:$0xff]  }
  0x12   : > { %v649_v23 = vld [vmem:[%s853_s4] ss:$0 sm:$0xff] }
  0x13   : > { %674 = vmatpush3.bf16.msra.mxu0 %v710_v3  ;;  %686 = vmatpush3.bf16.msra.mxu1 %v714_v8  ;;  %v653_v35 = vld [vmem:[%s855_s6] ss:$0 sm:$0xff] }
  0x14   : > { %675 = vmatprep.subr.bf16.mxu0 %v731_v0  ;;  %691 = vmatprep.subr.bf16.mxu1 %v731_v0  ;;  %v657_v45 = vld [vmem:[%s856_s7] ss:$0 sm:$0xff] }
  0x17   : > { %676 = vmatpush3.bf16.msra.mxu0 %v711_v4 }
  0x18   : > { %677 = vmatprep.subr.bf16.mxu0 %v731_v0 }
  0x1b   : > { %678 = vmatpush3.bf16.msra.mxu0 %v712_v5 }
  0x1e   : > { %680 = vmatmul.mubr.msk.bf16.vlgmr.msra.gmra.mxu0 %vm369_vm2, %v330_v6 }
  0xde   : > { %v411_v10 = vpop.f32.mrf.mxu0 }
  0xdf   : > { %v412_v11 = vadd.f32 %v643_v9, %v411_v10 }
  0xe0   : > { %v681_v12 = vpop.f32.mrf.mxu0 }
  0xe1   : > { %v417_v13 = vmul.f32 0.5, %v412_v11 }
  0xe2   : > { %v414_v14 = vpop.f32.mrf.mxu0 }
  0xe3   : > { %717 = vtanh.f32 %v417_v13 }
  0xe4   : > { %v682_v15 = vpop.f32.mrf.mxu0 }
  0xf0   : > { %v718_v16 = vpop.eup %717 }
  0xf1   : > { %v419_v17 = vadd.f32 1.0, %v718_v16 }
  0xf3   : > { %v420_v18 = vmul.f32 0.5, %v419_v17 }
  0xf5   : > { %v421_v19 = vmul.f32 %v420_v18, %v412_v11 }
  0xf7   : > { %v422_v20 = vpack.c.bf16 %v421_v19, %v421_v19 }
  0xf9   : > { %688 = vmatmul.mubr.msk.bf16.vlgmr.msra.gmra.mxu1 %vm446_vm3, %v422_v20 }
  0xfa   : > { %695 = vmatprep.mubr.msk.bf16.mxu1 %vm732_vm1, %v731_v0  ;;  %692 = vmatpush3.bf16.msra.mxu1 %v715_v21 }
  0xfb   : > { %693 = vmatprep.subr.bf16.mxu1 %v731_v0 }
  0xfe   : > { %694 = vmatpush3.bf16.msra.mxu1 %v716_v22 }
 0x1b9   : > { %v484_v24 = vpop.f32.mrf.mxu1 }
 0x1ba   : > { %v485_v25 = vadd.f32 %v649_v23, %v484_v24 }
 0x1bb   : > { %v689_v26 = vpop.f32.mrf.mxu1 }
 0x1bc   : > { %v490_v27 = vmul.f32 0.5, %v485_v25 }
 0x1bd   : > { %v487_v28 = vpop.f32.mrf.mxu1 }
 0x1be   : > { %719 = vtanh.f32 %v490_v27 }
 0x1bf   : > { %v690_v29 = vpop.f32.mrf.mxu1 }
 0x1cb   : > { %v720_v30 = vpop.eup %719 }
 0x1cc   : > { %v492_v31 = vadd.f32 1.0, %v720_v30 }
 0x1ce   : > { %v493_v32 = vmul.f32 0.5, %v492_v31 }
 0x1d0   : > { %v494_v33 = vmul.f32 %v493_v32, %v485_v25 }
 0x1d2   : > { %v495_v34 = vpack.c.bf16 %v494_v33, %v494_v33 }
 0x1d4   : > { %696 = vmatmul.mubr.msk.bf16.vlgmr.msra.gmra.mxu1 %vm446_vm3, %v495_v34 }
 0x294   : > { %v556_v36 = vpop.f32.mrf.mxu1 }
 0x295   : > { %v557_v37 = vadd.f32 %v653_v35, %v556_v36 }
 0x296   : > { %v697_v38 = vpop.f32.mrf.mxu1 }
 0x297   : > { %v562_v39 = vmul.f32 0.5, %v557_v37 }
 0x298   : > { %v559_v40 = vpop.f32.mrf.mxu1 }
 0x299   : > { %721 = vtanh.f32 %v562_v39 }
 0x29a   : > { %v698_v41 = vpop.f32.mrf.mxu1 }
 0x2a6   : > { %v722_v42 = vpop.eup %721 }
 0x2a7   : > { %v564_v43 = vadd.f32 1.0, %v722_v42 }
 0x2a9   : > { %v565_v44 = vmul.f32 0.5, %v564_v43 }
 0x2ab   : > { %v566_v46 = vmul.f32 %v565_v44, %v557_v37 }
 0x2ad   : > { %v574_v47 = vmul.f32 %v657_v45, %v566_v46 }
 0x2af   : > { %v575_v48 = vsel %vm446_vm3, %v574_v47, 0.0 }
 0x2b0   : > { %576 = vadd.xlane.f32.xlu0 %v575_v48 }
 0x339   : > { %v577_v50 = vpop.xlane.xlu0 %576 }
 0x33a   : > { %v580_v51 = vadd.f32 %v579_v49, %v577_v50 }
 0x33c   : > { %582 = vst.msk [vmem:[%s328_s24] sm:$0xff] %vm581_vm4, %v580_v51 }
 0x33d PF: > { %s20_s11 = sadd.s32 1, %s729_s11  }
 0x33e   : > { %p17_p4 = scmp.ge.s32.totalorder %s20_s11, 4  }
 0x340   :  { %19 = sbr.rel (!%p17_p4) target bundleno = 2 (0x2), region = 86 }

// kernel: tpu_custom_call.1
= control target key start
LH: loop header
LB: loop body
LE: loop exit
PB: predicated region body
PF: predicated region fallthrough
CT: control target
= control target key end

     0   :  { %s786_s11 = smov 0   ;;  %s849_s0 = inlined_call_operand.vmem [shape: bf16[16,60], index: 0, kind: input, shape index: {}]   ;;  %s850_s1 = inlined_call_operand.vmem [shape: bf16[60,32], index: 1, kind: input, shape index: {}]   ;;  %s851_s2 = inlined_call_operand.vmem [shape: f32[1,32], index: 2, kind: input, shape index: {}]   ;;  %s852_s3 = inlined_call_operand.vmem [shape: bf16[32,32], index: 3, kind: input, shape index: {}]   ;;  %s853_s4 = inlined_call_operand.vmem [shape: f32[1,32], index: 4, kind: input, shape index: {}]   ;;  %s854_s5 = inlined_call_operand.vmem [shape: bf16[32,32], index: 5, kind: input, shape index: {}]   ;;  %s855_s6 = inlined_call_operand.vmem [shape: f32[1,32], index: 6, kind: input, shape index: {}]   ;;  %s856_s7 = inlined_call_operand.vmem [shape: f32[1,32], index: 7, kind: input, shape index: {}]   ;;  %s857_s8 = inlined_call_operand.<no memory space> [shape: f32[1], index: 8, kind: input, shape index: {}]   ;;  %s858_s9 = inlined_call_operand.vmem [shape: f32[16,1], index: 9, kind: output, shape index: {}]  }
   0x1   :  { %14 = sst [smem:[#allocation2]] %s857_s8 }
   0x2 LB: > { %s636_s12 = sadd.s32 4294967295, %s729_s11   ;;  %p640_p0 = scmp.ge.s32.totalorder %s729_s11, 1  ;;  %s729_s11 = sphi %s786_s11, %s20_s11  }
   0x3   : > { %p287_p1 = scmp.lt.s32.totalorder %s729_s11, 3 }
   0x5   : > { %p288_p2 = pnand %p640_p0, %p287_p1 }
   0x6   : > { %p321_p3 = scmp.lt.s32.totalorder (!%p288_p2), %s636_s12, 1  ;;  %s578_s20 = sld [smem:[#allocation2]] (!%p288_p2) }
   0x7   : > { %291 = sbr.rel (%p288_p2) target bundleno = 829 (0x33d), region = 56 }
   0xc   : > { %vm373_vm0 = vcmask 1045504   ;;  %v731_v0 = vmov 0.0   ;;  %v709_v1 = vld [vmem:[%s850_s1 + $0x18] sm:$0x3f]   ;;  %vm732_vm1 = vmmov 0   ;;  %v710_v3 = vld [vmem:[%s850_s1 + $0x10] sm:$0xff]   ;;  %v579_v49 = vstv %s578_s20 }
   0xd   : > { %671 = vmatprep.subr.bf16.mxu0 %v731_v0  ;;  %683 = vmatprep.subr.bf16.mxu1 %v731_v0  ;;  %v375_v2 = vsel %vm373_vm0, %v709_v1, 0  ;;  %s860_s12 = smov (!%p321_p3, %s636_s12), 1  ;;  %v711_v4 = vld [vmem:[%s850_s1 + $0x8] sm:$0xff]   ;;  %v712_v5 = vld [vmem:[%s850_s1] sm:$0xff]   ;;  %vm369_vm2 = vcmask 490496   ;;  %vm446_vm3 = vcmask 261120  }
   0xe   : > { %679 = vmatprep.mubr.msk.bf16.mxu0 %vm732_vm1, %v731_v0  ;;  %687 = vmatprep.mubr.msk.bf16.mxu1 %vm732_vm1, %v731_v0  ;;  %s641_s18 = sshll.u32 %s860_s12, 2  ;;  %v713_v7 = vld [vmem:[%s852_s3 + $0x8] sm:$0xff]   ;;  %v714_v8 = vld [vmem:[%s852_s3] sm:$0xff]   ;;  %s642_s21 = sshll.u32 %s860_s12, 3  ;;  %vm581_vm4 = vcmask 7168  }
   0xf   : > { %672 = vmatpush3.bf16.msra.mxu0 %v375_v2  ;;  %s324_s23 = scalar_lea.vmem %s849_s0, %s641_s18  ;;  %684 = vmatpush3.bf16.msra.mxu1 %v713_v7  ;;  %v643_v9 = vld [vmem:[%s851_s2] ss:$0 sm:$0xff]  ;;  %v715_v21 = vld [vmem:[%s854_s5 + $0x8] sm:$0xff]   ;;  %s328_s24 = scalar_lea.vmem %s858_s9, %s642_s21 }
  0x10   : > { %673 = vmatprep.subr.bf16.mxu0 %v731_v0  ;;  %v330_v6 = vld [vmem:[%s324_s23] sm:$0xf]  ;;  %685 = vmatprep.subr.bf16.mxu1 %v731_v0 }
  0x11   : > { %v716_v22 = vld [vmem:[%s854_s5] sm:$0xff]  }
  0x12   : > { %v649_v23 = vld [vmem:[%s853_s4] ss:$0 sm:$0xff] }
  0x13   : > { %674 = vmatpush3.bf16.msra.mxu0 %v710_v3  ;;  %686 = vmatpush3.bf16.msra.mxu1 %v714_v8  ;;  %v653_v35 = vld [vmem:[%s855_s6] ss:$0 sm:$0xff] }
  0x14   : > { %675 = vmatprep.subr.bf16.mxu0 %v731_v0  ;;  %691 = vmatprep.subr.bf16.mxu1 %v731_v0  ;;  %v657_v45 = vld [vmem:[%s856_s7] ss:$0 sm:$0xff] }
  0x17   : > { %676 = vmatpush3.bf16.msra.mxu0 %v711_v4 }
  0x18   : > { %677 = vmatprep.subr.bf16.mxu0 %v731_v0 }
  0x1b   : > { %678 = vmatpush3.bf16.msra.mxu0 %v712_v5 }
  0x1e   : > { %680 = vmatmul.mubr.msk.bf16.vlgmr.msra.gmra.mxu0 %vm369_vm2, %v330_v6 }
  0xde   : > { %v411_v10 = vpop.f32.mrf.mxu0 }
  0xdf   : > { %v412_v11 = vadd.f32 %v643_v9, %v411_v10 }
  0xe0   : > { %v681_v12 = vpop.f32.mrf.mxu0 }
  0xe1   : > { %v417_v13 = vmul.f32 0.5, %v412_v11 }
  0xe2   : > { %v414_v14 = vpop.f32.mrf.mxu0 }
  0xe3   : > { %717 = vtanh.f32 %v417_v13 }
  0xe4   : > { %v682_v15 = vpop.f32.mrf.mxu0 }
  0xf0   : > { %v718_v16 = vpop.eup %717 }
  0xf1   : > { %v419_v17 = vadd.f32 1.0, %v718_v16 }
  0xf3   : > { %v420_v18 = vmul.f32 0.5, %v419_v17 }
  0xf5   : > { %v421_v19 = vmul.f32 %v420_v18, %v412_v11 }
  0xf7   : > { %v422_v20 = vpack.c.bf16 %v421_v19, %v421_v19 }
  0xf9   : > { %688 = vmatmul.mubr.msk.bf16.vlgmr.msra.gmra.mxu1 %vm446_vm3, %v422_v20 }
  0xfa   : > { %695 = vmatprep.mubr.msk.bf16.mxu1 %vm732_vm1, %v731_v0  ;;  %692 = vmatpush3.bf16.msra.mxu1 %v715_v21 }
  0xfb   : > { %693 = vmatprep.subr.bf16.mxu1 %v731_v0 }
  0xfe   : > { %694 = vmatpush3.bf16.msra.mxu1 %v716_v22 }
 0x1b9   : > { %v484_v24 = vpop.f32.mrf.mxu1 }
 0x1ba   : > { %v485_v25 = vadd.f32 %v649_v23, %v484_v24 }
 0x1bb   : > { %v689_v26 = vpop.f32.mrf.mxu1 }
 0x1bc   : > { %v490_v27 = vmul.f32 0.5, %v485_v25 }
 0x1bd   : > { %v487_v28 = vpop.f32.mrf.mxu1 }
 0x1be   : > { %719 = vtanh.f32 %v490_v27 }
 0x1bf   : > { %v690_v29 = vpop.f32.mrf.mxu1 }
 0x1cb   : > { %v720_v30 = vpop.eup %719 }
 0x1cc   : > { %v492_v31 = vadd.f32 1.0, %v720_v30 }
 0x1ce   : > { %v493_v32 = vmul.f32 0.5, %v492_v31 }
 0x1d0   : > { %v494_v33 = vmul.f32 %v493_v32, %v485_v25 }
 0x1d2   : > { %v495_v34 = vpack.c.bf16 %v494_v33, %v494_v33 }
 0x1d4   : > { %696 = vmatmul.mubr.msk.bf16.vlgmr.msra.gmra.mxu1 %vm446_vm3, %v495_v34 }
 0x294   : > { %v556_v36 = vpop.f32.mrf.mxu1 }
 0x295   : > { %v557_v37 = vadd.f32 %v653_v35, %v556_v36 }
 0x296   : > { %v697_v38 = vpop.f32.mrf.mxu1 }
 0x297   : > { %v562_v39 = vmul.f32 0.5, %v557_v37 }
 0x298   : > { %v559_v40 = vpop.f32.mrf.mxu1 }
 0x299   : > { %721 = vtanh.f32 %v562_v39 }
 0x29a   : > { %v698_v41 = vpop.f32.mrf.mxu1 }
 0x2a6   : > { %v722_v42 = vpop.eup %721 }
 0x2a7   : > { %v564_v43 = vadd.f32 1.0, %v722_v42 }
 0x2a9   : > { %v565_v44 = vmul.f32 0.5, %v564_v43 }
 0x2ab   : > { %v566_v46 = vmul.f32 %v565_v44, %v557_v37 }
 0x2ad   : > { %v574_v47 = vmul.f32 %v657_v45, %v566_v46 }
 0x2af   : > { %v575_v48 = vsel %vm446_vm3, %v574_v47, 0.0 }
 0x2b0   : > { %576 = vadd.xlane.f32.xlu0 %v575_v48 }
 0x339   : > { %v577_v50 = vpop.xlane.xlu0 %576 }
 0x33a   : > { %v580_v51 = vadd.f32 %v579_v49, %v577_v50 }
 0x33c   : > { %582 = vst.msk [vmem:[%s328_s24] sm:$0xff] %vm581_vm4, %v580_v51 }
 0x33d PF: > { %s20_s11 = sadd.s32 1, %s729_s11  }
 0x33e   : > { %p17_p4 = scmp.ge.s32.totalorder %s20_s11, 4  }
 0x340   :  { %19 = sbr.rel (!%p17_p4) target bundleno = 2 (0x2), region = 86 }

</bundles_post_ra>
